<compile_context>
chip_gen: v7x
topology: tpu7x:2x2x1
jax: 0.10.0
libtpu: 0.0.40
codegen_flags: <defaults>
</compile_context>

<pallas_src>
import jax
import jax.numpy as jnp
from jax.experimental import pallas as pl
from jax.experimental.pallas import tpu as pltpu


def _mlp_fused_kernel(jt_ref, gt_ref, w_ref, vec_ref, o_ref):
    e = jt_ref.shape[0]            # emb_dim
    h = e // 2

    w = w_ref[...]                 # (2E + E/2, E) bf16: [w1_job^T; w1_geek^T; w2^T]
    vec = vec_ref[...]             # (pad(2E+1), 1) f32: [b1 | b2 | w3 | b3]
    w1j_t = w[0:e, :]              # (E, E)
    w1g_t = w[e:2 * e, :]          # (E, E)
    w2_t = w[2 * e:2 * e + h, :]   # (E/2, E)
    b1 = vec[0:e, :]               # (E, 1)
    b2 = vec[e:e + h, :]           # (E/2, 1)
    w3c = vec[e + h:2 * e, :]      # (E/2, 1)
    b3 = vec[2 * e:2 * e + 1, :]   # (1, 1)

    jt = jt_ref[...]               # (E, T) bf16, samples on lanes
    gt = gt_ref[...]

    # Layer 1 (2E -> E), concat fused away: two K=E matmuls summed, fp32 accumulation.
    h1 = (jnp.dot(w1j_t, jt, preferred_element_type=jnp.float32)
          + jnp.dot(w1g_t, gt, preferred_element_type=jnp.float32))
    h1 = jnp.maximum(h1 + b1, 0.0)                       # (E, T) fp32

    # Layer 2 (E -> E/2).
    h2 = jnp.dot(w2_t, h1.astype(jt.dtype), preferred_element_type=jnp.float32)
    h2 = jnp.maximum(h2 + b2, 0.0)                       # (E/2, T) fp32

    # Layer 3 (E/2 -> 1): VPU broadcast-mul + sublane reduce instead of a width-1 MXU op.
    logit = jnp.sum(h2 * w3c, axis=0, keepdims=True) + b3   # (1, T) fp32, lane-dense
    o_ref[...] = jax.nn.sigmoid(logit)


def mlp_fused_pallas(jt, gt, w_slab, vec_slab, *, tile_rows=512):
    """jt, gt: (E, N_pad) bf16 (features on sublanes, samples on lanes).
    Returns sigmoid scores of shape (1, N_pad) float32."""
    e, n_pad = jt.shape
    assert tile_rows % 128 == 0 and n_pad % tile_rows == 0
    grid = (n_pad // tile_rows,)

    flops = n_pad * (2 * (2 * e) * e + 2 * e * (e // 2) + 2 * (e // 2))
    bytes_accessed = (2 * e * n_pad * 2                      # jt + gt (bf16)
                      + w_slab.shape[0] * w_slab.shape[1] * 2
                      + vec_slab.shape[0] * 4
                      + n_pad * 4)                           # output (f32)

    return pl.pallas_call(
        _mlp_fused_kernel,
        out_shape=jax.ShapeDtypeStruct((1, n_pad), jnp.float32),
        grid_spec=pltpu.PrefetchScalarGridSpec(
            num_scalar_prefetch=0,
            grid=grid,
            in_specs=[
                pl.BlockSpec((e, tile_rows), lambda i: (0, i)),   # j^T tile (pipelined)
                pl.BlockSpec((e, tile_rows), lambda i: (0, i)),   # g^T tile (pipelined)
                pl.BlockSpec(w_slab.shape, lambda i: (0, 0)),     # weight slab, resident
                pl.BlockSpec(vec_slab.shape, lambda i: (0, 0)),   # bias slab, resident
            ],
            out_specs=pl.BlockSpec((1, tile_rows), lambda i: (0, i)),  # lane-dense out
        ),
        compiler_params=pltpu.CompilerParams(dimension_semantics=("parallel",)),
        cost_estimate=pl.CostEstimate(flops=flops, transcendentals=n_pad,
                                      bytes_accessed=bytes_accessed),
    )(jt, gt, w_slab, vec_slab)


class MLPPallas:
    """JAX/Pallas port of the PyTorch MLP module (forward pass)."""

    def __init__(self, n_job, n_geek, emb_dim, key, tile_rows=512):
        assert emb_dim % 16 == 0, "emb_dim must be a multiple of 16 (bf16 sublane packing)"
        self.shape = (n_job, n_geek)
        self.emb_dim = emb_dim
        self.tile_rows = tile_rows
        dim = emb_dim * 2
        k = jax.random.split(key, 8)

        # Embedding tables (torch nn.Embedding default init: N(0, 1)).
        self.job_emb = jax.random.normal(k[0], (n_job, emb_dim), jnp.float32)
        self.geek_emb = jax.random.normal(k[1], (n_geek, emb_dim), jnp.float32)
        # Transposed copies so the gather directly yields the kernel's (E, N) layout.
        self.job_emb_t = self.job_emb.T
        self.geek_emb_t = self.geek_emb.T

        def linear_init(kw, kb, fan_in, fan_out):
            bound = 1.0 / float(fan_in) ** 0.5
            w = jax.random.uniform(kw, (fan_in, fan_out), jnp.float32, -bound, bound)
            b = jax.random.uniform(kb, (fan_out,), jnp.float32, -bound, bound)
            return w, b

        self.w1, self.b1 = linear_init(k[2], k[3], dim, dim // 2)        # (2E, E), (E,)
        self.w2, self.b2 = linear_init(k[4], k[5], dim // 2, dim // 4)   # (E, E/2), (E/2,)
        self.w3, self.b3 = linear_init(k[6], k[7], dim // 4, 1)          # (E/2, 1), (1,)

        # One bf16 weight slab: [w1_job^T; w1_geek^T; w2^T] -> (2E + E/2, E).
        self.w_slab = jnp.concatenate(
            [self.w1[:emb_dim, :].T, self.w1[emb_dim:, :].T, self.w2.T], axis=0
        ).astype(jnp.bfloat16)
        # One f32 column slab: [b1 | b2 | w3 | b3], padded to a multiple of 8 sublanes.
        vec = jnp.concatenate([self.b1, self.b2, self.w3[:, 0], self.b3])
        pad = (-vec.shape[0]) % 8
        self.vec_slab = jnp.pad(vec, (0, pad)).reshape(-1, 1)

    def forward(self, job, geek):
        # job, geek: int32 of shape (B, 1) (same convention as the torch module).
        b, s = job.shape
        n = b * s
        tile = self.tile_rows
        n_pad = ((n + tile - 1) // tile) * tile
        job_idx = jnp.pad(job.reshape(-1), (0, n_pad - n))
        geek_idx = jnp.pad(geek.reshape(-1), (0, n_pad - n))
        # Gather directly in transposed layout (E, N_pad); bf16 feed for the MXU.
        # TODO(synk): at very large N, fuse this gather in-kernel (scalar-prefetch row
        # gather) to also remove the (E, N) activation round-trip through HBM.
        jt = jnp.take(self.job_emb_t, job_idx, axis=1).astype(jnp.bfloat16)
        gt = jnp.take(self.geek_emb_t, geek_idx, axis=1).astype(jnp.bfloat16)
        out = mlp_fused_pallas(jt, gt, self.w_slab, self.vec_slab, tile_rows=tile)
        out = out[0, :n].reshape(b, s, 1)
        return jnp.squeeze(out, axis=1)   # (B, 1), matches x.squeeze(dim=1)


def _reference_forward(model, job, geek):
    # Pure-JAX reference mirroring the kernel's bf16-matmul / fp32-accumulate numerics.
    j = jnp.take(model.job_emb, job, axis=0)      # (B, 1, E)
    g = jnp.take(model.geek_emb, geek, axis=0)    # (B, 1, E)
    x = jnp.concatenate((j, g), axis=-1).astype(jnp.bfloat16)
    h = jnp.dot(x, model.w1.astype(jnp.bfloat16), preferred_element_type=jnp.float32)
    h = jnp.maximum(h + model.b1, 0.0)
    h = jnp.dot(h.astype(jnp.bfloat16), model.w2.astype(jnp.bfloat16),
                preferred_element_type=jnp.float32)
    h = jnp.maximum(h + model.b2, 0.0)
    h = jax.nn.sigmoid(jnp.dot(h, model.w3) + model.b3)   # last layer fp32, like kernel
    return jnp.squeeze(h, axis=1)


if __name__ == "__main__":
    key = jax.random.PRNGKey(0)
    n_job, n_geek, emb_dim = 16, 24, 32   # dim = 64 -> 32 -> 16 -> 1
    batch = 8

    model = MLPPallas(n_job, n_geek, emb_dim, key)

    kj, kg = jax.random.split(jax.random.PRNGKey(1))
    job = jax.random.randint(kj, (batch, 1), 0, n_job, dtype=jnp.int32)
    geek = jax.random.randint(kg, (batch, 1), 0, n_geek, dtype=jnp.int32)

    out = model.forward(job, geek)
    jax.block_until_ready(out)

    ref = _reference_forward(model, job, geek)
    assert out.shape == (batch, 1), out.shape
    max_err = float(jnp.max(jnp.abs(out - ref)))
    assert jnp.allclose(out, ref, atol=2e-3, rtol=2e-3), max_err

    print("KERNEL_OK")
</pallas_src>

<mosaic_0001>
module attributes {stable_mosaic.version = 11 : i64} {
  func.func @_mlp_fused_kernel(%arg0: i32, %arg1: memref<32x512xbf16, #tpu.memory_space<vmem>>, %arg2: memref<32x512xbf16, #tpu.memory_space<vmem>>, %arg3: memref<80x32xbf16, #tpu.memory_space<vmem>>, %arg4: memref<72x1xf32, #tpu.memory_space<vmem>>, %arg5: memref<1x512xf32, #tpu.memory_space<vmem>>) attributes {dimension_semantics = [#tpu.dimension_semantics<parallel>], iteration_bounds = array<i64: 1>, scalar_prefetch = 0 : i64, scratch_operands = 0 : i64, tpu.core_type = #tpu.core_type<tc>, window_params = [{transform_indices = @transform_0, window_bounds = array<i64: 32, 512>}, {transform_indices = @transform_1, window_bounds = array<i64: 32, 512>}, {pipeline_mode = #tpu.pipeline_mode<synchronous>, transform_indices = @transform_2, window_bounds = array<i64: 80, 32>}, {pipeline_mode = #tpu.pipeline_mode<synchronous>, transform_indices = @transform_3, window_bounds = array<i64: 72, 1>}, {transform_indices = @transform_4, window_bounds = array<i64: 1, 512>}]} {
    %c0 = arith.constant 0 : index
    %c0_0 = arith.constant 0 : index
    %0 = vector.load %arg3[%c0, %c0_0] : memref<80x32xbf16, #tpu.memory_space<vmem>>, vector<80x32xbf16>
    %c0_1 = arith.constant 0 : index
    %c0_2 = arith.constant 0 : index
    %1 = vector.load %arg4[%c0_1, %c0_2] : memref<72x1xf32, #tpu.memory_space<vmem>>, vector<72x1xf32>
    %2 = vector.extract_strided_slice %0 {offsets = [0, 0], sizes = [32, 32], strides = [1, 1]} : vector<80x32xbf16> to vector<32x32xbf16>
    %3 = vector.extract_strided_slice %0 {offsets = [32, 0], sizes = [32, 32], strides = [1, 1]} : vector<80x32xbf16> to vector<32x32xbf16>
    %4 = vector.extract_strided_slice %0 {offsets = [64, 0], sizes = [16, 32], strides = [1, 1]} : vector<80x32xbf16> to vector<16x32xbf16>
    %5 = vector.extract_strided_slice %1 {offsets = [0, 0], sizes = [32, 1], strides = [1, 1]} : vector<72x1xf32> to vector<32x1xf32>
    %6 = vector.extract_strided_slice %1 {offsets = [32, 0], sizes = [16, 1], strides = [1, 1]} : vector<72x1xf32> to vector<16x1xf32>
    %7 = vector.extract_strided_slice %1 {offsets = [48, 0], sizes = [16, 1], strides = [1, 1]} : vector<72x1xf32> to vector<16x1xf32>
    %8 = vector.extract_strided_slice %1 {offsets = [64, 0], sizes = [1, 1], strides = [1, 1]} : vector<72x1xf32> to vector<1x1xf32>
    %c0_3 = arith.constant 0 : index
    %c0_4 = arith.constant 0 : index
    %9 = vector.load %arg1[%c0_3, %c0_4] : memref<32x512xbf16, #tpu.memory_space<vmem>>, vector<32x512xbf16>
    %c0_5 = arith.constant 0 : index
    %c0_6 = arith.constant 0 : index
    %10 = vector.load %arg2[%c0_5, %c0_6] : memref<32x512xbf16, #tpu.memory_space<vmem>>, vector<32x512xbf16>
    %cst = arith.constant dense<0.000000e+00> : vector<32x512xf32>
    %11 = tpu.matmul %2, %9, %cst {dimension_numbers = #tpu.dot_dimension_numbers<[1], [0], [0], [1], [0, 0, 1, 1], [], []>} : vector<32x32xbf16>, vector<32x512xbf16>, vector<32x512xf32> -> vector<32x512xf32>
    %cst_7 = arith.constant dense<0.000000e+00> : vector<32x512xf32>
    %12 = tpu.matmul %3, %10, %cst_7 {dimension_numbers = #tpu.dot_dimension_numbers<[1], [0], [0], [1], [0, 0, 1, 1], [], []>} : vector<32x32xbf16>, vector<32x512xbf16>, vector<32x512xf32> -> vector<32x512xf32>
    %13 = arith.addf %11, %12 : vector<32x512xf32>
    %14 = vector.broadcast %5 : vector<32x1xf32> to vector<32x512xf32>
    %15 = arith.addf %13, %14 : vector<32x512xf32>
    %cst_8 = arith.constant 0.000000e+00 : f32
    %16 = vector.broadcast %cst_8 : f32 to vector<32x512xf32>
    %17 = arith.maximumf %15, %16 : vector<32x512xf32>
    %18 = arith.truncf %17 : vector<32x512xf32> to vector<32x512xbf16>
    %cst_9 = arith.constant dense<0.000000e+00> : vector<16x512xf32>
    %19 = tpu.matmul %4, %18, %cst_9 {dimension_numbers = #tpu.dot_dimension_numbers<[1], [0], [0], [1], [0, 0, 1, 1], [], []>} : vector<16x32xbf16>, vector<32x512xbf16>, vector<16x512xf32> -> vector<16x512xf32>
    %20 = vector.broadcast %6 : vector<16x1xf32> to vector<16x512xf32>
    %21 = arith.addf %19, %20 : vector<16x512xf32>
    %cst_10 = arith.constant 0.000000e+00 : f32
    %22 = vector.broadcast %cst_10 : f32 to vector<16x512xf32>
    %23 = arith.maximumf %21, %22 : vector<16x512xf32>
    %24 = vector.broadcast %7 : vector<16x1xf32> to vector<16x512xf32>
    %25 = arith.mulf %23, %24 : vector<16x512xf32>
    %cst_11 = arith.constant dense<0.000000e+00> : vector<512xf32>
    %26 = vector.multi_reduction <add>, %25, %cst_11 [0] : vector<16x512xf32> to vector<512xf32>
    %27 = vector.shape_cast %26 : vector<512xf32> to vector<1x512xf32>
    %28 = vector.broadcast %8 : vector<1x1xf32> to vector<1x512xf32>
    %29 = arith.addf %27, %28 : vector<1x512xf32>
    %30 = arith.negf %29 : vector<1x512xf32>
    %31 = math.exp %30 : vector<1x512xf32>
    %cst_12 = arith.constant 1.000000e+00 : f32
    %32 = vector.broadcast %cst_12 : f32 to vector<1x512xf32>
    %33 = arith.addf %32, %31 : vector<1x512xf32>
    %34 = arith.divf %32, %33 : vector<1x512xf32>
    %c0_13 = arith.constant 0 : index
    %c0_14 = arith.constant 0 : index
    %35 = vector.load %arg5[%c0_13, %c0_14] : memref<1x512xf32, #tpu.memory_space<vmem>>, vector<1x512xf32>
    tpu.vector_store %arg5[%c0_13, %c0_14], %34 {strides = array<i32>} : memref<1x512xf32, #tpu.memory_space<vmem>>, vector<1x512xf32>,
    return
  }
  func.func @transform_0(%arg0: i32) -> (i32, i32) {
    %c0_i32 = arith.constant 0 : i32
    %c0_i32_0 = arith.constant 0 : i32
    return %c0_i32, %arg0 : i32, i32
  }
  func.func @transform_1(%arg0: i32) -> (i32, i32) {
    %c0_i32 = arith.constant 0 : i32
    %c0_i32_0 = arith.constant 0 : i32
    return %c0_i32, %arg0 : i32, i32
  }
  func.func @transform_2(%arg0: i32) -> (i32, i32) {
    %c0_i32 = arith.constant 0 : i32
    %c0_i32_0 = arith.constant 0 : i32
    %c0_i32_1 = arith.constant 0 : i32
    return %c0_i32, %c0_i32_0 : i32, i32
  }
  func.func @transform_3(%arg0: i32) -> (i32, i32) {
    %c0_i32 = arith.constant 0 : i32
    %c0_i32_0 = arith.constant 0 : i32
    %c0_i32_1 = arith.constant 0 : i32
    return %c0_i32, %c0_i32_0 : i32, i32
  }
  func.func @transform_4(%arg0: i32) -> (i32, i32) {
    %c0_i32 = arith.constant 0 : i32
    %c0_i32_0 = arith.constant 0 : i32
    return %c0_i32, %arg0 : i32, i32
  }
}

</mosaic_0001>

<bundles_post_ra>
// kernel: tpu_custom_call.1
= control target key start
LH: loop header
LB: loop body
LE: loop exit
PB: predicated region body
PF: predicated region fallthrough
CT: control target
= control target key end

     0   :  { %v803_v2 = vmov 0   ;;  %vm104_vm0 = vcmask 261120   ;;  %s955_s0 = inlined_call_operand.vmem [shape: bf16[32,512], index: 0, kind: input, shape index: {}]   ;;  %s956_s1 = inlined_call_operand.vmem [shape: bf16[32,512], index: 1, kind: input, shape index: {}]   ;;  %s957_s2 = inlined_call_operand.vmem [shape: bf16[80,32], index: 2, kind: input, shape index: {}]   ;;  %s958_s3 = inlined_call_operand.vmem [shape: f32[72,1], index: 3, kind: input, shape index: {}]   ;;  %s959_s4 = inlined_call_operand.hbm [shape: f32[1,512], index: 4, kind: output, shape index: {}]  }
   0x1   :  { %v734_v0 = vld [vmem:[%s956_s1 + $0x4] ss:$16 sps:$4 sm:$0xff]   ;;  %v736_v1 = vld [vmem:[%s956_s1 + $0xc] ss:$16 sps:$4 sm:$0xff]   ;;  %143 = vmatprep.mubr.bf16.mxu0 %v803_v2  ;;  %196 = vmatprep.mubr.bf16.mxu1 %v803_v2  ;;  %v738_v3 = vld [vmem:[%s956_s1] ss:$16 sps:$4 sm:$0xff]  }
   0x2   :  { %111 = vmatprep.subr.bf16.mxu0 %v734_v0  ;;  %v739_v4 = vld [vmem:[%s956_s1 + $0x8] ss:$16 sps:$4 sm:$0xff]   ;;  %732 = vset.pattern.permute.xlu0 %v803_v2  ;;  %v740_v5 = vld [vmem:[%s956_s1 + $0x24] ss:$16 sps:$4 sm:$0xff]   ;;  %v742_v6 = vld [vmem:[%s956_s1 + $0x2c] ss:$16 sps:$4 sm:$0xff]  }
   0x3   :  { %164 = vmatprep.subr.bf16.mxu1 %v736_v1  ;;  %733 = vset.pattern.permute.xlu1 %v803_v2  ;;  %v744_v7 = vld [vmem:[%s956_s1 + $0x20] ss:$16 sps:$4 sm:$0xff]   ;;  %v745_v8 = vld [vmem:[%s956_s1 + $0x28] ss:$16 sps:$4 sm:$0xff]   ;;  %v749_v11 = vld [vmem:[%s955_s0 + $0x4] ss:$16 sps:$4 sm:$0xff]  }
   0x4   :  { %112 = vmatpush1.bf16.msra.mxu0 %v738_v3  ;;  %165 = vmatpush1.bf16.msra.mxu1 %v739_v4  ;;  %v746_v9 = vld [vmem:[%s957_s2 + $0x10] sm:$0xff]   ;;  %v750_v12 = vld [vmem:[%s955_s0 + $0x8] ss:$16 sps:$4 sm:$0xff]   ;;  %v752_v13 = vld [vmem:[%s955_s0 + $0xc] ss:$16 sps:$4 sm:$0xff]  }
   0x5   :  { %113 = vmatprep.subr.bf16.mxu0 %v740_v5  ;;  %166 = vmatprep.subr.bf16.mxu1 %v742_v6  ;;  %v747_v10 = vld [vmem:[%s955_s0] ss:$16 sps:$4 sm:$0xff]   ;;  %v756_v15 = vld [vmem:[%s955_s0 + $0x24] ss:$16 sps:$4 sm:$0xff]   ;;  %v757_v16 = vld [vmem:[%s955_s0 + $0x28] ss:$16 sps:$4 sm:$0xff]  }
   0x6   :  { %v754_v14 = vld [vmem:[%s955_s0 + $0x20] ss:$16 sps:$4 sm:$0xff]   ;;  %v759_v17 = vld [vmem:[%s955_s0 + $0x2c] ss:$16 sps:$4 sm:$0xff]  }
   0x7   :  { %v29_v18 = vld [vmem:[%s958_s3] sm:$0xff]  ;;  %v753_v19 = vld [vmem:[%s957_s2 + $0x18] sm:$0xff]   ;;  %v31_v20 = vld [vmem:[%s958_s3 + $0x10] sm:$0xff] }
   0x8   :  { %114 = vmatpush1.bf16.msra.mxu0 %v744_v7  ;;  %167 = vmatpush1.bf16.msra.mxu1 %v745_v8  ;;  %v30_v21 = vld [vmem:[%s958_s3 + $0x8] sm:$0xff]  ;;  %v32_v22 = vld [vmem:[%s958_s3 + $0x18] sm:$0xff] }
   0x9   :  { %273 = vmatprep.subr.bf16.mxu0 %v749_v11  ;;  %326 = vmatprep.subr.bf16.mxu1 %v752_v13 }
   0xa   :  { %381 = vperm.xlu0 %732, %v29_v18   ;;  %391 = vperm.xlu1 %733, %v31_v20  }
   0xb   :  { %688 = vmatmul.mubr.msk.bf16.vlgmr.msra.gmra.mrb[0].mxu0 %vm104_vm0, %v746_v9  ;;  %690 = vmatmul.mubr.msk.bf16.vlgmr.msra.gmra.mrb[0].mxu1 %vm104_vm0, %v746_v9 }
   0xc   :  { %274 = vmatpush1.bf16.msra.mxu0 %v747_v10  ;;  %327 = vmatpush1.bf16.msra.mxu1 %v750_v12 }
   0xd   :  { %153 = vmatprep.mubr.bf16.mxu0 %v803_v2  ;;  %206 = vmatprep.mubr.bf16.mxu1 %v803_v2 }
   0xe   :  { %275 = vmatprep.subr.bf16.mxu0 %v756_v15  ;;  %328 = vmatprep.subr.bf16.mxu1 %v759_v17 }
  0x10   :  { %276 = vmatpush1.bf16.msra.mxu0 %v754_v14  ;;  %329 = vmatpush1.bf16.msra.mxu1 %v757_v16 }
  0x11   :  { %9 = vsyncpa [#allocation3], 0  ;;  %386 = vperm.xlu0 %732, %v30_v21   ;;  %396 = vperm.xlu1 %733, %v32_v22   ;;  %v33_v23 = vld [vmem:[%s958_s3 + $0x20] sm:$0xff]  ;;  %v34_v24 = vld [vmem:[%s958_s3 + $0x28] sm:$0xff] }
  0x12   :  { %v760_v25 = vld [vmem:[%s957_s2] sm:$0xff]   ;;  %v35_v26 = vld [vmem:[%s958_s3 + $0x30] sm:$0xff]  ;;  %v36_v27 = vld [vmem:[%s958_s3 + $0x38] sm:$0xff] }
  0x13   :  { %689 = vmatmul.mubr.msk.bf16.gmra.mrb[4].mxu0 %vm104_vm0, %v753_v19  ;;  %691 = vmatmul.mubr.msk.bf16.gmra.mrb[4].mxu1 %vm104_vm0, %v753_v19  ;;  %v37_v28 = vld [vmem:[%s958_s3 + $0x40] sm:$0xff]  ;;  %v761_v29 = vld [vmem:[%s957_s2 + $0x8] sm:$0xff]  }
  0x14   :  { %305 = vmatprep.mubr.bf16.mxu0 %v803_v2  ;;  %358 = vmatprep.mubr.bf16.mxu1 %v803_v2 }
  0x15   :  { %441 = vperm.xlu0 %732, %v33_v23   ;;  %446 = vperm.xlu1 %733, %v34_v24  }
  0x19   :  { %553 = vperm.xlu0 %732, %v35_v26   ;;  %558 = vperm.xlu1 %733, %v36_v27   ;;  %v762_v26 = vld [vmem:[%s957_s2 + $0x20] sm:$0xff]   ;;  %s805_s2 = smov [#allocation2]  }
  0x1a   :  { %s670_s19 = sshll.u32 %s805_s2, 4  ;;  %s671_s19 = int_to_ptr.vmem [resolvable:$true] %s670_s19 }
  0x1b   :  { %702 = vmatmul.mubr.msk.bf16.vlgmr.msra.gmra.mrb[0].mxu0 %vm104_vm0, %v760_v25  ;;  %704 = vmatmul.mubr.msk.bf16.vlgmr.msra.gmra.mrb[0].mxu1 %vm104_vm0, %v760_v25  ;;  %s779_s20 = scalar_lea.vmem %s671_s19, 64  ;;  %p784_p1 = scmp.lt.s32.totalorder %s671_s19, %s671_s19 }
  0x1c   :  { %315 = vmatprep.mubr.bf16.mxu0 %v803_v2  ;;  %368 = vmatprep.mubr.bf16.mxu1 %v803_v2  ;;  %p780_p0 = scmp.ne.s32.totalorder %s671_s19, %s779_s20  ;;  %p785_p2 = scmp.lt.s32.totalorder %s779_s20, %s779_s20 }
  0x1d   :  { %599 = vperm.xlu0 %732, %v37_v28  }
  0x1e   :  { %p786_p3 = por %p785_p2, %p784_p1 }
  0x20   :  { %p787_p4 = pnand %p786_p3, %p780_p0 }
  0x23   :  { %703 = vmatmul.mubr.msk.bf16.gmra.mrb[4].mxu0 %vm104_vm0, %v761_v29  ;;  %705 = vmatmul.mubr.msk.bf16.gmra.mrb[4].mxu1 %vm104_vm0, %v761_v29 }
  0x24   :  { %489 = vmatprep.mubr.bf16.mxu0 %v803_v2  ;;  %532 = vmatprep.mubr.bf16.mxu1 %v803_v2 }
  0x89   :  { %v382_v30 = vpop.permute.xlu0 %381  ;;  %v392_v32 = vpop.permute.xlu1 %391 }
  0x90   :  { %v387_v31 = vpop.permute.xlu0 %386  ;;  %v397_v57 = vpop.permute.xlu1 %396 }
  0x94   :  { %v442_v27 = vpop.permute.xlu0 %441  ;;  %v447_v28 = vpop.permute.xlu1 %446 }
  0xee   :  { %v307_v33 = vpop.f32.mrb[0].mxu0  ;;  %v360_v34 = vpop.f32.mrb[0].mxu1 }
  0xef   :  { %v399_v35 = vadd.f32 %v382_v30, %v307_v33  ;;  %v401_v36 = vadd.f32 %v382_v30, %v360_v34  ;;  %v309_v37 = vpop.f32.mrb[1].mxu0  ;;  %v362_v38 = vpop.f32.mrb[1].mxu1 }
  0xf0   :  { %v400_v39 = vadd.f32 %v382_v30, %v309_v37  ;;  %v402_v40 = vadd.f32 %v382_v30, %v362_v38  ;;  %v311_v41 = vpop.f32.mrb[2].mxu0  ;;  %v364_v42 = vpop.f32.mrb[2].mxu1 }
  0xf1   :  { %v403_v43 = vadd.f32 %v387_v31, %v311_v41  ;;  %v405_v44 = vadd.f32 %v387_v31, %v364_v42  ;;  %v313_v45 = vpop.f32.mrb[3].mxu0  ;;  %v366_v46 = vpop.f32.mrb[3].mxu1  ;;  %v415_v49 = vmax.f32 %v399_v35, 0.0  ;;  %v417_v50 = vmax.f32 %v401_v36, 0.0 }
  0xf2   :  { %v404_v47 = vadd.f32 %v387_v31, %v313_v45  ;;  %v406_v48 = vadd.f32 %v387_v31, %v366_v46  ;;  %v416_v53 = vmax.f32 %v400_v39, 0.0  ;;  %v418_v54 = vmax.f32 %v402_v40, 0.0 }
  0xf3   :  { %v419_v51 = vmax.f32 %v403_v43, 0.0  ;;  %v421_v52 = vmax.f32 %v405_v44, 0.0 }
  0xf4   :  { %v420_v55 = vmax.f32 %v404_v47, 0.0  ;;  %v422_v56 = vmax.f32 %v406_v48, 0.0 }
  0xf5   :  { %v431_v58 = vpack.c.bf16 %v419_v51, %v415_v49  ;;  %v433_v59 = vpack.c.bf16 %v421_v52, %v417_v50  ;;  %v554_v51 = vpop.permute.xlu0 %553  ;;  %v559_v52 = vpop.permute.xlu1 %558 }
  0xf6   :  { %v432_v60 = vpack.c.bf16 %v420_v55, %v416_v53  ;;  %v434_v61 = vpack.c.bf16 %v422_v56, %v418_v54  ;;  %v317_v62 = vpop.f32.mrb[4].mxu0  ;;  %v370_v63 = vpop.f32.mrb[4].mxu1 }
  0xf7   :  { %v407_v0 = vadd.f32 %v392_v32, %v317_v62  ;;  %v409_v1 = vadd.f32 %v392_v32, %v370_v63  ;;  %v319_v2 = vpop.f32.mrb[5].mxu0  ;;  %v372_v3 = vpop.f32.mrb[5].mxu1 }
  0xf8   :  { %v408_v4 = vadd.f32 %v392_v32, %v319_v2  ;;  %v410_v5 = vadd.f32 %v392_v32, %v372_v3  ;;  %v321_v6 = vpop.f32.mrb[6].mxu0  ;;  %v374_v7 = vpop.f32.mrb[6].mxu1  ;;  %457 = vmatprep.subr.bf16.mxu0 %v432_v60  ;;  %500 = vmatprep.subr.bf16.mxu1 %v434_v61 }
  0xf9   :  { %v411_v8 = vadd.f32 %v397_v57, %v321_v6  ;;  %v413_v9 = vadd.f32 %v397_v57, %v374_v7  ;;  %v323_v10 = vpop.f32.mrb[7].mxu0  ;;  %v376_v11 = vpop.f32.mrb[7].mxu1  ;;  %458 = vmatpush1.bf16.msra.mxu0 %v431_v58  ;;  %501 = vmatpush1.bf16.msra.mxu1 %v433_v59  ;;  %v423_v14 = vmax.f32 %v407_v0, 0.0  ;;  %v425_v15 = vmax.f32 %v409_v1, 0.0 }
  0xfa   :  { %v412_v12 = vadd.f32 %v397_v57, %v323_v10  ;;  %v414_v13 = vadd.f32 %v397_v57, %v376_v11  ;;  %v424_v18 = vmax.f32 %v408_v4, 0.0  ;;  %v426_v19 = vmax.f32 %v410_v5, 0.0 }
  0xfb   :  { %v427_v16 = vmax.f32 %v411_v8, 0.0  ;;  %v429_v17 = vmax.f32 %v413_v9, 0.0 }
  0xfc   :  { %v428_v20 = vmax.f32 %v412_v12, 0.0  ;;  %v430_v21 = vmax.f32 %v414_v13, 0.0 }
  0xfd   :  { %v435_v22 = vpack.c.bf16 %v427_v16, %v423_v14  ;;  %v437_v23 = vpack.c.bf16 %v429_v17, %v425_v15 }
  0xfe   :  { %v436_v24 = vpack.c.bf16 %v428_v20, %v424_v18  ;;  %v438_v25 = vpack.c.bf16 %v430_v21, %v426_v19 }
 0x100   :  { %459 = vmatprep.subr.bf16.mxu0 %v436_v24  ;;  %502 = vmatprep.subr.bf16.mxu1 %v438_v25  ;;  %v600_v25 = vpop.permute.xlu0 %599 }
 0x101   :  { %460 = vmatpush1.bf16.msra.mxu0 %v435_v22  ;;  %503 = vmatpush1.bf16.msra.mxu1 %v437_v23 }
 0x104   :  { %707 = vmatmul.mubr.msk.bf16.vlgmr.msra.gmra.mrb[8].mxu0 %vm104_vm0, %v762_v26  ;;  %708 = vmatmul.mubr.msk.bf16.vlgmr.msra.gmra.mrb[8].mxu1 %vm104_vm0, %v762_v26 }
 0x1d7   :  { %v491_v29 = vpop.f32.mrb[8].mxu0  ;;  %v534_v30 = vpop.f32.mrb[8].mxu1 }
 0x1d8   :  { %v492_v31 = vadd.f32 %v491_v29, %v442_v27  ;;  %v535_v32 = vadd.f32 %v534_v30, %v442_v27  ;;  %v493_v33 = vpop.f32.mrb[9].mxu0  ;;  %v536_v34 = vpop.f32.mrb[9].mxu1 }
 0x1d9   :  { %v494_v35 = vadd.f32 %v493_v33, %v442_v27  ;;  %v537_v36 = vadd.f32 %v536_v34, %v442_v27  ;;  %v495_v37 = vpop.f32.mrb[10].mxu0  ;;  %v538_v38 = vpop.f32.mrb[10].mxu1 }
 0x1da   :  { %v543_v39 = vmax.f32 %v492_v31, 0.0  ;;  %v545_v40 = vmax.f32 %v535_v32, 0.0  ;;  %v496_v41 = vadd.f32 %v495_v37, %v447_v28  ;;  %v539_v42 = vadd.f32 %v538_v38, %v447_v28  ;;  %v497_v43 = vpop.f32.mrb[11].mxu0  ;;  %v540_v44 = vpop.f32.mrb[11].mxu1 }
 0x1db   :  { %v544_v45 = vmax.f32 %v494_v35, 0.0  ;;  %v546_v46 = vmax.f32 %v537_v36, 0.0  ;;  %v498_v47 = vadd.f32 %v497_v43, %v447_v28  ;;  %v541_v48 = vadd.f32 %v540_v44, %v447_v28 }
 0x1dc   :  { %v547_v49 = vmax.f32 %v496_v41, 0.0  ;;  %v549_v50 = vmax.f32 %v539_v42, 0.0  ;;  %v561_v55 = vmul.f32 %v554_v51, %v543_v39  ;;  %v563_v56 = vmul.f32 %v554_v51, %v545_v40 }
 0x1dd   :  { %v548_v53 = vmax.f32 %v498_v47, 0.0  ;;  %v550_v54 = vmax.f32 %v541_v48, 0.0  ;;  %v562_v59 = vmul.f32 %v554_v51, %v544_v45  ;;  %v564_v60 = vmul.f32 %v554_v51, %v546_v46 }
 0x1de   :  { %v565_v57 = vmul.f32 %v559_v52, %v547_v49  ;;  %v567_v58 = vmul.f32 %v559_v52, %v549_v50  ;;  %v804_v44 = vmov 1966171168   ;;  %v639_v46 = vlaneseq }
 0x1df   :  { %v566_v61 = vmul.f32 %v559_v52, %v548_v53  ;;  %v568_v62 = vmul.f32 %v559_v52, %v550_v54  ;;  %v637_v45 = vunpack.c.l.s4 %v804_v44 }
 0x1e0   :  { %v569_v63 = vadd.f32 %v565_v57, %v561_v55  ;;  %v583_v0 = vadd.f32 %v567_v58, %v563_v56  ;;  %v640_v48 = vshrl.u32 %v639_v46, 7  ;;  %vm661_vm1 = vcmp.lt.s32.totalorder %v639_v46, 512 }
 0x1e1   :  { %v576_v1 = vadd.f32 %v566_v61, %v562_v59  ;;  %v590_v2 = vadd.f32 %v568_v62, %v564_v60  ;;  %v638_v47 = vunpack.c.0.s8 %v637_v45 }
 0x1e2   :  { %v570_v3 = vrot.slane %v569_v63, 4  ;;  %v584_v4 = vrot.slane %v583_v0, 4 }
 0x1e3   :  { %v577_v5 = vrot.slane %v576_v1, 4  ;;  %v591_v6 = vrot.slane %v590_v2, 4  ;;  %v641_v51 = vsub.s32 %v638_v47, %v640_v48 }
 0x1e4   :  { %v571_v7 = vadd.f32 %v570_v3, %v569_v63  ;;  %v585_v8 = vadd.f32 %v584_v4, %v583_v0 }
 0x1e5   :  { %v578_v9 = vadd.f32 %v577_v5, %v576_v1  ;;  %v592_v10 = vadd.f32 %v591_v6, %v590_v2 }
 0x1e6   :  { %v572_v11 = vrot.slane %v571_v7, 2  ;;  %v586_v12 = vrot.slane %v585_v8, 2 }
 0x1e7   :  { %v579_v13 = vrot.slane %v578_v9, 2  ;;  %v593_v14 = vrot.slane %v592_v10, 2 }
 0x1e8   :  { %v573_v15 = vadd.f32 %v572_v11, %v571_v7  ;;  %v587_v16 = vadd.f32 %v586_v12, %v585_v8 }
 0x1e9   :  { %v580_v17 = vadd.f32 %v579_v13, %v578_v9  ;;  %v594_v18 = vadd.f32 %v593_v14, %v592_v10 }
 0x1ea   :  { %v574_v19 = vrot.slane %v573_v15, 1  ;;  %v588_v20 = vrot.slane %v587_v16, 1 }
 0x1eb   :  { %v581_v21 = vrot.slane %v580_v17, 1  ;;  %v595_v22 = vrot.slane %v594_v18, 1 }
 0x1ec   :  { %v575_v23 = vadd.f32 %v574_v19, %v573_v15  ;;  %v589_v24 = vadd.f32 %v588_v20, %v587_v16 }
 0x1ed   :  { %v582_v26 = vadd.f32 %v581_v21, %v580_v17  ;;  %v596_v27 = vadd.f32 %v595_v22, %v594_v18 }
 0x1ee   :  { %v602_v28 = vadd.f32 %v600_v25, %v575_v23  ;;  %v604_v29 = vadd.f32 %v600_v25, %v589_v24 }
 0x1ef   :  { %v603_v30 = vadd.f32 %v600_v25, %v582_v26  ;;  %v605_v31 = vadd.f32 %v600_v25, %v596_v27 }
 0x1f0   :  { %v709_v32 = vmul.f32 -1.442695, %v602_v28  ;;  %v711_v33 = vmul.f32 -1.442695, %v604_v29 }
 0x1f1   :  { %v710_v34 = vmul.f32 -1.442695, %v603_v30  ;;  %v712_v35 = vmul.f32 -1.442695, %v605_v31 }
 0x1f2   :  { %763 = vpow2.f32 %v709_v32 }
 0x1f3   :  { %765 = vpow2.f32 %v711_v33 }
 0x1f4   :  { %767 = vpow2.f32 %v710_v34 }
 0x1f5   :  { %769 = vpow2.f32 %v712_v35 }
 0x1fc   :  { %v764_v36 = vpop.eup %763 }
 0x1fd   :  { %v766_v37 = vpop.eup %765  ;;  %v618_v38 = vadd.f32 1.0, %v764_v36 }
 0x1fe   :  { %v768_v39 = vpop.eup %767  ;;  %v620_v40 = vadd.f32 1.0, %v766_v37 }
 0x1ff   :  { %v770_v41 = vpop.eup %769  ;;  %771 = vrcp.f32 %v618_v38  ;;  %v619_v42 = vadd.f32 1.0, %v768_v39 }
 0x200   :  { %773 = vrcp.f32 %v620_v40  ;;  %v621_v43 = vadd.f32 1.0, %v770_v41 }
 0x201   :  { %775 = vrcp.f32 %v619_v42 }
 0x202   :  { %777 = vrcp.f32 %v621_v43 }
 0x209   :  { %v772_v49 = vpop.eup %771 }
 0x20a   :  { %v774_v50 = vpop.eup %773 }
 0x20b   :  { %v776_v52 = vpop.eup %775 }
 0x20c   :  { %v778_v53 = vpop.eup %777  ;;  %v634_v54 = vcombine.low %v772_v49, %v776_v52 }
 0x20d   :  { %v635_v55 = vcombine.low %v774_v50, %v778_v53 }
 0x20e   :  { %v642_v56 = vrot.slane %v634_v54, %v641_v51 }
 0x20f   :  { %v649_v57 = vrot.slane %v635_v55, %v641_v51 }
 0x211   :  { %v650_v58 = vcombine.low %v642_v56, %v649_v57 }
 0x213   :  { %v657_v59 = vrot.slane %v650_v58, %v641_v51 }
 0x215   :  { %663 = vst.msk [vmem:[#allocation2] sm:$0xf] %vm661_vm1, %v657_v59 }
 0x216   :  { %790 = shalt.err (!%p787_p4)
}
 0x217   :  { %s791_s23 = scalar_lea.hbm %s959_s4, 64 }
 0x218   :  { %p792_p5 = scmp.ne.s32.totalorder %s959_s4, %s791_s23  ;;  %p795_p6 = scmp.lt.u32.totalorder %s791_s23, %s959_s4 }
 0x21a   :  { %p797_p7 = pnand %p795_p6, %p792_p5 }
 0x21c   :  { %800 = shalt.err (!%p797_p7)
}
 0x21d   :  { %673 = dma.vmem_to_hbm [thread:$0]  %s671_s19, 64, %s959_s4, [#allocation3]  }
 0x21e   :  { %801 = dma.done.wait [#allocation3], 64  }
 0x21f   :  { %802 = vsyncadd [#allocation3], 4294967232 }
 0x220   :  { %677 = vsyncpa [#allocation3], 1 }

</bundles_post_ra>
